<compile_context>
chip_gen: v7x
topology: tpu7x:2x2x1
jax: 0.10.0
libtpu: 0.0.40
codegen_flags: <defaults>
</compile_context>

<pallas_src>
import math

import jax
import jax.numpy as jnp
from jax import lax
from jax.experimental import pallas as pl
from jax.experimental.pallas import tpu as pltpu


def _round_up(v, m):
    return ((v + m - 1) // m) * m


def _cosine_margin_kernel(w_ref, x_ref, nx_ref, nw_ref, o_ref, acc_ref):
    k = pl.program_id(2)

    @pl.when(k == 0)
    def _init():
        acc_ref[...] = jnp.zeros_like(acc_ref)

    # weight tile (tk, tm) contracted with x tile (tk, tn) over F_in -> (tm, tn).
    # Native-dtype operands, f32 MXU accumulation.
    acc_ref[...] += lax.dot_general(
        w_ref[...],
        x_ref[...],
        (((0,), (0,)), ((), ())),
        preferred_element_type=jnp.float32,
    )

    @pl.when(k == pl.num_programs(2) - 1)
    def _finalize():
        # den[i, j] = max(||x_i|| * ||w_j||, 1e-8): broadcast (tm,1)*(1,tn) on the
        # VPU; clamp the *product* to match torch's .clamp(min=1e-8) exactly.
        den = jnp.maximum(nx_ref[...] * nw_ref[...], 1e-8)
        o_ref[...] = (acc_ref[...] / den).astype(o_ref.dtype)


def cosine_margin_product(x, weight, *, tm=None, tn=None, tk=None):
    """x: (features_in, N), weight: (features_in, features_out) -> cosine (features_out, N)."""
    f_in, n = x.shape
    f_in_w, f_out = weight.shape
    assert f_in == f_in_w
    # The reference denominator is (F_in, F_in); only shape-valid in this case.
    assert f_out == f_in and n == f_in, (
        "reference forward only broadcasts when features_in == features_out == N"
    )

    # Tile sizes: adaptive so tiny problems become a single lane-dense tile,
    # realistic problems get a pipelined multi-step grid.
    if tm is None:
        tm = min(256, _round_up(f_out, 128))
    if tn is None:
        tn = min(256, _round_up(n, 128))
    if tk is None:
        tk = min(512, _round_up(f_in, 128))

    f_out_p = _round_up(f_out, tm)
    n_p = _round_up(n, tn)
    f_in_p = _round_up(f_in, tk)

    # --- Hoisted norm pass (memory-bound, O(F_in*(N+F_out))) --------------------
    xf = x.astype(jnp.float32)
    wf = weight.astype(jnp.float32)
    w1 = jnp.sqrt(jnp.sum(xf * xf, axis=1))        # (f_in,)  == torch.norm(x, 2, 1)
    w2 = jnp.sqrt(jnp.sum(wf * wf, axis=1))        # (f_in,)  == torch.norm(weight, 2, 1)

    # w1 indexes the output ROW (f_out axis), w2 the output COLUMN (batch axis),
    # reproducing torch.ger(w1, w2) as the denominator.  Padded region gets norm 0
    # -> clamped den, zero numerator, and is sliced off below.
    w1_col = jnp.pad(w1, (0, f_out_p - f_in)).reshape(f_out_p, 1)
    w2_row = jnp.pad(w2, (0, n_p - f_in)).reshape(1, n_p)

    # --- Pad matmul operands to tile multiples (zeros add nothing to the sum) ---
    w_p = jnp.pad(weight, ((0, f_in_p - f_in), (0, f_out_p - f_out)))
    x_p = jnp.pad(x, ((0, f_in_p - f_in), (0, n_p - n)))

    grid = (f_out_p // tm, n_p // tn, f_in_p // tk)

    out = pl.pallas_call(
        _cosine_margin_kernel,
        out_shape=jax.ShapeDtypeStruct((f_out_p, n_p), jnp.float32),
        grid_spec=pltpu.PrefetchScalarGridSpec(
            num_scalar_prefetch=0,
            grid=grid,
            in_specs=[
                pl.BlockSpec((tk, tm), lambda i, j, k: (k, i)),  # weight tile
                pl.BlockSpec((tk, tn), lambda i, j, k: (k, j)),  # x tile
                pl.BlockSpec((tm, 1), lambda i, j, k: (i, 0)),   # ||x rows|| column
                pl.BlockSpec((1, tn), lambda i, j, k: (0, j)),   # ||w rows|| row
            ],
            out_specs=pl.BlockSpec((tm, tn), lambda i, j, k: (i, j)),
            scratch_shapes=[pltpu.VMEM((tm, tn), jnp.float32)],
        ),
        compiler_params=pltpu.CompilerParams(
            # Output axes parallel (2-TC sharding on v7x), reduction axis arbitrary.
            dimension_semantics=("parallel", "parallel", "arbitrary"),
        ),
    )(w_p, x_p, w1_col, w2_row)

    return out[:f_out, :n]


def _reference(x, weight):
    w1 = jnp.sqrt(jnp.sum(x * x, axis=1))            # (F_in,)
    w2 = jnp.sqrt(jnp.sum(weight * weight, axis=1))  # (F_in,)
    num = weight.T @ x                               # (F_out, N)
    den = jnp.maximum(jnp.outer(w1, w2), 1e-8)       # (F_in, F_in)
    return num / den


if __name__ == "__main__":
    key = jax.random.PRNGKey(0)
    kx, kw = jax.random.split(key)

    # --- Small case consistent with the module (F_in == F_out == N required) ----
    features = 32
    x = jax.random.normal(kx, (features, features), dtype=jnp.float32)
    bound = math.sqrt(6.0 / (features + features))   # Xavier-uniform for (F_in, F_out)
    weight = jax.random.uniform(
        kw, (features, features), dtype=jnp.float32, minval=-bound, maxval=bound
    )

    out = jax.block_until_ready(cosine_margin_product(x, weight))
    ref = _reference(x, weight)
    assert out.shape == (features, features)
    assert jnp.allclose(out, ref, atol=1e-5, rtol=1e-5)

    # --- Exercise the multi-tile grid (accumulation over K + padding path) ------
    f2 = 320
    bound2 = math.sqrt(6.0 / (f2 + f2))
    x2 = jax.random.normal(kx, (f2, f2), dtype=jnp.float32)
    weight2 = jax.random.uniform(
        kw, (f2, f2), dtype=jnp.float32, minval=-bound2, maxval=bound2
    )
    out2 = jax.block_until_ready(
        cosine_margin_product(x2, weight2, tm=128, tn=128, tk=128)
    )
    ref2 = _reference(x2, weight2)
    assert out2.shape == (f2, f2)
    assert jnp.allclose(out2, ref2, atol=1e-4, rtol=1e-4)

    print("KERNEL_OK")
</pallas_src>

<mosaic_0001>
module attributes {stable_mosaic.version = 11 : i64} {
  func.func @_cosine_margin_kernel(%arg0: i32, %arg1: i32, %arg2: i32, %arg3: memref<128x128xf32, #tpu.memory_space<vmem>>, %arg4: memref<128x128xf32, #tpu.memory_space<vmem>>, %arg5: memref<128x1xf32, #tpu.memory_space<vmem>>, %arg6: memref<1x128xf32, #tpu.memory_space<vmem>>, %arg7: memref<128x128xf32, #tpu.memory_space<vmem>>, %arg8: memref<128x128xf32, #tpu.memory_space<vmem>>) attributes {dimension_semantics = [#tpu.dimension_semantics<parallel>, #tpu.dimension_semantics<parallel>, #tpu.dimension_semantics<arbitrary>], iteration_bounds = array<i64: 1, 1, 1>, scalar_prefetch = 0 : i64, scratch_operands = 1 : i64, tpu.core_type = #tpu.core_type<tc>, window_params = [{transform_indices = @transform_0, window_bounds = array<i64: 128, 128>}, {transform_indices = @transform_1, window_bounds = array<i64: 128, 128>}, {transform_indices = @transform_2, window_bounds = array<i64: 128, 1>}, {transform_indices = @transform_3, window_bounds = array<i64: 1, 128>}, {transform_indices = @transform_4, window_bounds = array<i64: 128, 128>}]} {
    %c0_i32 = arith.constant 0 : i32
    %0 = arith.cmpi eq, %arg2, %c0_i32 : i32
    %1 = arith.extui %0 : i1 to i32
    %c0_i32_0 = arith.constant 0 : i32
    %2 = arith.cmpi ne, %1, %c0_i32_0 : i32
    scf.if %2 {
      %cst_10 = arith.constant 0.000000e+00 : f32
      %12 = vector.broadcast %cst_10 : f32 to vector<128x128xf32>
      %c0_11 = arith.constant 0 : index
      %c0_12 = arith.constant 0 : index
      %13 = vector.load %arg8[%c0_11, %c0_12] : memref<128x128xf32, #tpu.memory_space<vmem>>, vector<128x128xf32>
      tpu.vector_store %arg8[%c0_11, %c0_12], %12 {strides = array<i32>} : memref<128x128xf32, #tpu.memory_space<vmem>>, vector<128x128xf32>,
    } else {
    }
    %c0 = arith.constant 0 : index
    %c0_1 = arith.constant 0 : index
    %3 = vector.load %arg8[%c0, %c0_1] : memref<128x128xf32, #tpu.memory_space<vmem>>, vector<128x128xf32>
    %c0_2 = arith.constant 0 : index
    %c0_3 = arith.constant 0 : index
    %4 = vector.load %arg3[%c0_2, %c0_3] : memref<128x128xf32, #tpu.memory_space<vmem>>, vector<128x128xf32>
    %c0_4 = arith.constant 0 : index
    %c0_5 = arith.constant 0 : index
    %5 = vector.load %arg4[%c0_4, %c0_5] : memref<128x128xf32, #tpu.memory_space<vmem>>, vector<128x128xf32>
    %cst = arith.constant dense<0.000000e+00> : vector<128x128xf32>
    %6 = tpu.matmul %4, %5, %cst {dimension_numbers = #tpu.dot_dimension_numbers<[0], [0], [1], [1], [0, 1, 1, 1], [], []>} : vector<128x128xf32>, vector<128x128xf32>, vector<128x128xf32> -> vector<128x128xf32>
    %7 = arith.addf %3, %6 : vector<128x128xf32>
    %c0_6 = arith.constant 0 : index
    %c0_7 = arith.constant 0 : index
    %8 = vector.load %arg8[%c0_6, %c0_7] : memref<128x128xf32, #tpu.memory_space<vmem>>, vector<128x128xf32>
    tpu.vector_store %arg8[%c0_6, %c0_7], %7 {strides = array<i32>} : memref<128x128xf32, #tpu.memory_space<vmem>>, vector<128x128xf32>,
    %c0_i32_8 = arith.constant 0 : i32
    %9 = arith.cmpi eq, %arg2, %c0_i32_8 : i32
    %10 = arith.extui %9 : i1 to i32
    %c0_i32_9 = arith.constant 0 : i32
    %11 = arith.cmpi ne, %10, %c0_i32_9 : i32
    scf.if %11 {
      %c0_10 = arith.constant 0 : index
      %c0_11 = arith.constant 0 : index
      %12 = vector.load %arg5[%c0_10, %c0_11] : memref<128x1xf32, #tpu.memory_space<vmem>>, vector<128x1xf32>
      %c0_12 = arith.constant 0 : index
      %c0_13 = arith.constant 0 : index
      %13 = vector.load %arg6[%c0_12, %c0_13] : memref<1x128xf32, #tpu.memory_space<vmem>>, vector<1x128xf32>
      %14 = vector.broadcast %12 : vector<128x1xf32> to vector<128x128xf32>
      %15 = vector.broadcast %13 : vector<1x128xf32> to vector<128x128xf32>
      %16 = arith.mulf %14, %15 : vector<128x128xf32>
      %cst_14 = arith.constant 9.99999993E-9 : f32
      %17 = vector.broadcast %cst_14 : f32 to vector<128x128xf32>
      %18 = arith.maximumf %16, %17 : vector<128x128xf32>
      %c0_15 = arith.constant 0 : index
      %c0_16 = arith.constant 0 : index
      %19 = vector.load %arg8[%c0_15, %c0_16] : memref<128x128xf32, #tpu.memory_space<vmem>>, vector<128x128xf32>
      %20 = arith.divf %19, %18 : vector<128x128xf32>
      %c0_17 = arith.constant 0 : index
      %c0_18 = arith.constant 0 : index
      %21 = vector.load %arg7[%c0_17, %c0_18] : memref<128x128xf32, #tpu.memory_space<vmem>>, vector<128x128xf32>
      tpu.vector_store %arg7[%c0_17, %c0_18], %20 {strides = array<i32>} : memref<128x128xf32, #tpu.memory_space<vmem>>, vector<128x128xf32>,
    } else {
    }
    return
  }
  func.func @transform_0(%arg0: i32, %arg1: i32, %arg2: i32) -> (i32, i32) {
    %c0_i32 = arith.constant 0 : i32
    return %arg2, %arg0 : i32, i32
  }
  func.func @transform_1(%arg0: i32, %arg1: i32, %arg2: i32) -> (i32, i32) {
    %c0_i32 = arith.constant 0 : i32
    return %arg2, %arg1 : i32, i32
  }
  func.func @transform_2(%arg0: i32, %arg1: i32, %arg2: i32) -> (i32, i32) {
    %c0_i32 = arith.constant 0 : i32
    %c0_i32_0 = arith.constant 0 : i32
    return %arg0, %c0_i32 : i32, i32
  }
  func.func @transform_3(%arg0: i32, %arg1: i32, %arg2: i32) -> (i32, i32) {
    %c0_i32 = arith.constant 0 : i32
    %c0_i32_0 = arith.constant 0 : i32
    return %c0_i32, %arg1 : i32, i32
  }
  func.func @transform_4(%arg0: i32, %arg1: i32, %arg2: i32) -> (i32, i32) {
    %c0_i32 = arith.constant 0 : i32
    return %arg0, %arg1 : i32, i32
  }
}

</mosaic_0001>

<bundles_post_ra>
// kernel: tpu_custom_call.1
= control target key start
LH: loop header
LB: loop body
LE: loop exit
PB: predicated region body
PF: predicated region fallthrough
CT: control target
= control target key end

     0   :  { %9 = vsyncpa [#allocation4], 0  ;;  %s931_s0 = inlined_call_operand.vmem [shape: f32[128,128], index: 0, kind: input, shape index: {}]   ;;  %s932_s1 = inlined_call_operand.hbm [shape: f32[128,128], index: 1, kind: input, shape index: {}]   ;;  %s933_s2 = inlined_call_operand.vmem [shape: f32[128,1], index: 2, kind: input, shape index: {}]   ;;  %s934_s3 = inlined_call_operand.vmem [shape: f32[1,128], index: 3, kind: input, shape index: {}]   ;;  %s935_s4 = inlined_call_operand.hbm [shape: f32[128,128], index: 4, kind: output, shape index: {}]  }
   0x1   :  { %10 = vsyncpa [#allocation5], 0  ;;  %s752_s15 = smov [#allocation3]   ;;  %s704_s19 = scalar_lea.hbm %s932_s1, 2048 }
   0x2   :  { %s18_s16 = sshll.u32 %s752_s15, 4  ;;  %p705_p0 = scmp.ne.s32.totalorder %s932_s1, %s704_s19  ;;  %s19_s16 = int_to_ptr.vmem [resolvable:$true] %s18_s16 }
   0x3   :  { %p708_p1 = scmp.lt.u32.totalorder %s704_s19, %s932_s1 }
   0x5   :  { %p710_p2 = pnand %p708_p1, %p705_p0 }
   0x7   :  { %713 = shalt.err (!%p710_p2)
}
   0x8   :  { %s714_s24 = scalar_lea.vmem %s19_s16, 2048  ;;  %p719_p4 = scmp.lt.s32.totalorder %s19_s16, %s19_s16 }
   0x9   :  { %p715_p3 = scmp.ne.s32.totalorder %s19_s16, %s714_s24  ;;  %p720_p5 = scmp.lt.s32.totalorder %s714_s24, %s714_s24 }
   0xb   :  { %p721_p6 = por %p720_p5, %p719_p4 }
   0xd   :  { %p722_p7 = pnand %p721_p6, %p715_p3 }
   0xf   :  { %725 = shalt.err (!%p722_p7)
}
  0x10   :  { %s753_s25 = smov 128   ;;  %s754_s26 = smov 8  }
  0x11   :  { %24 = dma.hbm_to_vmem [thread:$0]  %s932_s1, 2048, %s19_s16, [#allocation4], %s753_s25, %s753_s25, %s754_s26  }
  0x12   :  { %748 = dma.done.wait [#allocation4], 2048  }
  0x13   :  { %749 = vsyncadd [#allocation4], 4294965248  ;;  %v68_v0 = vld [vmem:[%s931_s0] sm:$0xff]  ;;  %v69_v1 = vld [vmem:[%s931_s0 + $0x8] sm:$0xff]  ;;  %v755_v16 = vmov 0  }
  0x14   :  { %100 = vxpose.xlu0.b32.start [1/16] %v68_v0, 128  ;;  %v84_v2 = vld [vmem:[#allocation3] sm:$0xff]  ;;  %v85_v3 = vld [vmem:[#allocation3 + $0x8] sm:$0xff]  ;;  %v70_v4 = vld [vmem:[%s931_s0 + $0x10] sm:$0xff]  ;;  %670 = vset.pattern.permute.xlu1 %v755_v16 }
  0x15   :  { %v617_v5 = vpack.c.bf16 %v85_v3, %v84_v2  ;;  %v86_v6 = vld [vmem:[#allocation3 + $0x10] sm:$0xff]  ;;  %v87_v7 = vld [vmem:[#allocation3 + $0x18] sm:$0xff]  ;;  %v88_v9 = vld [vmem:[#allocation3 + $0x20] sm:$0xff] }
  0x16   :  { %v621_v8 = vpack.c.bf16 %v87_v7, %v86_v6  ;;  %v89_v10 = vld [vmem:[#allocation3 + $0x28] sm:$0xff]  ;;  %v71_v11 = vld [vmem:[%s931_s0 + $0x18] sm:$0xff]  ;;  %v312_v13 = vld [vmem:[%s933_s2] sm:$0xff] }
  0x17   :  { %618 = vmatprep.subr.bf16.mxu0 %v617_v5  ;;  %649 = vmatprep.subr.bf16.mxu1 %v617_v5  ;;  %v625_v12 = vpack.c.bf16 %v89_v10, %v88_v9  ;;  %v90_v14 = vld [vmem:[#allocation3 + $0x30] sm:$0xff]  ;;  %v91_v15 = vld [vmem:[#allocation3 + $0x38] sm:$0xff]  ;;  %v72_v17 = vld [vmem:[%s931_s0 + $0x20] sm:$0xff] }
  0x18   :  { %101 = vxpose.xlu0.b32.cont [2/16] %v69_v1, 128  ;;  %620 = vmatpush3.bf16.msra.mxu0 %v617_v5  ;;  %v629_v18 = vpack.c.bf16 %v91_v15, %v90_v14  ;;  %v313_v19 = vld [vmem:[%s933_s2 + $0x8] sm:$0xff]  ;;  %v92_v20 = vld [vmem:[#allocation3 + $0x40] sm:$0xff]  ;;  %v314_v24 = vld [vmem:[%s933_s2 + $0x10] sm:$0xff] }
  0x19   :  { %622 = vmatprep.subr.bf16.mxu0 %v621_v8  ;;  %657 = vmatpush3.bf16.msra.mxu1 %v617_v5  ;;  %v93_v21 = vld [vmem:[#allocation3 + $0x48] sm:$0xff]  ;;  %v94_v25 = vld [vmem:[#allocation3 + $0x50] sm:$0xff]  ;;  %v95_v26 = vld [vmem:[#allocation3 + $0x58] sm:$0xff] }
  0x1a   :  { %650 = vmatprep.subr.bf16.mxu1 %v621_v8  ;;  %331 = vperm.xlu1 %670, %v312_v13   ;;  %v73_v22 = vld [vmem:[%s931_s0 + $0x28] sm:$0xff]  ;;  %v633_v23 = vpack.c.bf16 %v93_v21, %v92_v20  ;;  %v74_v27 = vld [vmem:[%s931_s0 + $0x30] sm:$0xff]  ;;  %v637_v28 = vpack.c.bf16 %v95_v26, %v94_v25  ;;  %v315_v29 = vld [vmem:[%s933_s2 + $0x18] sm:$0xff] }
  0x1b   :  { %v96_v30 = vld [vmem:[#allocation3 + $0x60] sm:$0xff]  ;;  %v97_v31 = vld [vmem:[#allocation3 + $0x68] sm:$0xff]  ;;  %v75_v32 = vld [vmem:[%s931_s0 + $0x38] sm:$0xff] }
  0x1c   :  { %102 = vxpose.xlu0.b32.cont [3/16] %v70_v4, 128  ;;  %624 = vmatpush3.bf16.msra.mxu0 %v621_v8  ;;  %v641_v33 = vpack.c.bf16 %v97_v31, %v96_v30  ;;  %v316_v34 = vld [vmem:[%s933_s2 + $0x20] sm:$0xff]  ;;  %v98_v35 = vld [vmem:[#allocation3 + $0x70] sm:$0xff]  ;;  %v99_v36 = vld [vmem:[#allocation3 + $0x78] sm:$0xff] }
  0x1d   :  { %626 = vmatprep.subr.bf16.mxu0 %v625_v12  ;;  %658 = vmatpush3.bf16.msra.mxu1 %v621_v8  ;;  %v76_v37 = vld [vmem:[%s931_s0 + $0x40] sm:$0xff]  ;;  %v645_v38 = vpack.c.bf16 %v99_v36, %v98_v35  ;;  %v317_v39 = vld [vmem:[%s933_s2 + $0x28] sm:$0xff]  ;;  %v318_v41 = vld [vmem:[%s933_s2 + $0x30] sm:$0xff] }
  0x1e   :  { %651 = vmatprep.subr.bf16.mxu1 %v625_v12  ;;  %336 = vperm.xlu1 %670, %v313_v19   ;;  %v77_v40 = vld [vmem:[%s931_s0 + $0x48] sm:$0xff]  ;;  %v78_v42 = vld [vmem:[%s931_s0 + $0x50] sm:$0xff]  ;;  %v319_v43 = vld [vmem:[%s933_s2 + $0x38] sm:$0xff] }
  0x1f   :  { %v79_v44 = vld [vmem:[%s931_s0 + $0x58] sm:$0xff]  ;;  %v320_v45 = vld [vmem:[%s933_s2 + $0x40] sm:$0xff]  ;;  %v321_v47 = vld [vmem:[%s933_s2 + $0x48] sm:$0xff] }
  0x20   :  { %103 = vxpose.xlu0.b32.cont [4/16] %v71_v11, 128  ;;  %628 = vmatpush3.bf16.msra.mxu0 %v625_v12  ;;  %v80_v46 = vld [vmem:[%s931_s0 + $0x60] sm:$0xff]  ;;  %v81_v48 = vld [vmem:[%s931_s0 + $0x68] sm:$0xff]  ;;  %v322_v49 = vld [vmem:[%s933_s2 + $0x50] sm:$0xff] }
  0x21   :  { %630 = vmatprep.subr.bf16.mxu0 %v629_v18  ;;  %659 = vmatpush3.bf16.msra.mxu1 %v625_v12  ;;  %v82_v50 = vld [vmem:[%s931_s0 + $0x70] sm:$0xff]  ;;  %v323_v51 = vld [vmem:[%s933_s2 + $0x58] sm:$0xff]  ;;  %v324_v53 = vld [vmem:[%s933_s2 + $0x60] sm:$0xff] }
  0x22   :  { %652 = vmatprep.subr.bf16.mxu1 %v629_v18  ;;  %341 = vperm.xlu1 %670, %v314_v24   ;;  %v83_v52 = vld [vmem:[%s931_s0 + $0x78] sm:$0xff]  ;;  %v325_v54 = vld [vmem:[%s933_s2 + $0x68] sm:$0xff]  ;;  %v326_v55 = vld [vmem:[%s933_s2 + $0x70] sm:$0xff] }
  0x23   :  { %v327_v56 = vld [vmem:[%s933_s2 + $0x78] sm:$0xff]  ;;  %v898_v15 = vld [vmem:[%s934_s3] ss:$0 sm:$0xff]  ;;  %s756_s3 = smov [#allocation6]  }
  0x24   :  { %104 = vxpose.xlu0.b32.cont [5/16] %v72_v17, 128  ;;  %632 = vmatpush3.bf16.msra.mxu0 %v629_v18  ;;  %s516_s16 = sshll.u32 %s756_s3, 4  ;;  %s517_s16 = int_to_ptr.vmem [resolvable:$true] %s516_s16 }
  0x25   :  { %634 = vmatprep.subr.bf16.mxu0 %v633_v23  ;;  %660 = vmatpush3.bf16.msra.mxu1 %v629_v18  ;;  %s726_s17 = scalar_lea.vmem %s517_s16, 2048  ;;  %p731_p9 = scmp.lt.s32.totalorder %s517_s16, %s517_s16 }
  0x26   :  { %653 = vmatprep.subr.bf16.mxu1 %v633_v23  ;;  %346 = vperm.xlu1 %670, %v315_v29   ;;  %p727_p8 = scmp.ne.s32.totalorder %s517_s16, %s726_s17  ;;  %p732_p10 = scmp.lt.s32.totalorder %s726_s17, %s726_s17 }
  0x28   :  { %105 = vxpose.xlu0.b32.cont [6/16] %v73_v22, 128  ;;  %636 = vmatpush3.bf16.msra.mxu0 %v633_v23  ;;  %p733_p11 = por %p732_p10, %p731_p9 }
  0x29   :  { %638 = vmatprep.subr.bf16.mxu0 %v637_v28  ;;  %661 = vmatpush3.bf16.msra.mxu1 %v633_v23 }
  0x2a   :  { %654 = vmatprep.subr.bf16.mxu1 %v637_v28  ;;  %351 = vperm.xlu1 %670, %v316_v34   ;;  %p734_p12 = pnand %p733_p11, %p727_p8 }
  0x2c   :  { %106 = vxpose.xlu0.b32.cont [7/16] %v74_v27, 128  ;;  %640 = vmatpush3.bf16.msra.mxu0 %v637_v28 }
  0x2d   :  { %642 = vmatprep.subr.bf16.mxu0 %v641_v33  ;;  %662 = vmatpush3.bf16.msra.mxu1 %v637_v28 }
  0x2e   :  { %655 = vmatprep.subr.bf16.mxu1 %v641_v33  ;;  %356 = vperm.xlu1 %670, %v317_v39  }
  0x30   :  { %107 = vxpose.xlu0.b32.cont [8/16] %v75_v32, 128  ;;  %644 = vmatpush3.bf16.msra.mxu0 %v641_v33 }
  0x31   :  { %646 = vmatprep.subr.bf16.mxu0 %v645_v38  ;;  %663 = vmatpush3.bf16.msra.mxu1 %v641_v33 }
  0x32   :  { %656 = vmatprep.subr.bf16.mxu1 %v645_v38  ;;  %361 = vperm.xlu1 %670, %v318_v41  }
  0x34   :  { %108 = vxpose.xlu0.b32.cont [9/16] %v76_v37, 128  ;;  %648 = vmatpush3.bf16.msra.mxu0 %v645_v38 }
  0x35   :  { %664 = vmatpush3.bf16.msra.mxu1 %v645_v38 }
  0x36   :  { %366 = vperm.xlu1 %670, %v319_v43  }
  0x38   :  { %109 = vxpose.xlu0.b32.cont [10/16] %v77_v40, 128 }
  0x3a   :  { %371 = vperm.xlu1 %670, %v320_v45  }
  0x3c   :  { %110 = vxpose.xlu0.b32.cont [11/16] %v78_v42, 128 }
  0x3e   :  { %376 = vperm.xlu1 %670, %v321_v47  }
  0x40   :  { %111 = vxpose.xlu0.b32.cont [12/16] %v79_v44, 128 }
  0x42   :  { %381 = vperm.xlu1 %670, %v322_v49  }
  0x44   :  { %112 = vxpose.xlu0.b32.cont [13/16] %v80_v46, 128 }
  0x46   :  { %386 = vperm.xlu1 %670, %v323_v51  }
  0x48   :  { %113 = vxpose.xlu0.b32.cont [14/16] %v81_v48, 128 }
  0x4a   :  { %391 = vperm.xlu1 %670, %v324_v53  }
  0x4c   :  { %114 = vxpose.xlu0.b32.cont [15/16] %v82_v50, 128 }
  0x4e   :  { %396 = vperm.xlu1 %670, %v325_v54  }
  0x50   :  { %115 = vxpose.xlu0.b32.end [16/16] %v83_v52, 128 }
  0x52   :  { %401 = vperm.xlu1 %670, %v326_v55  }
  0x56   :  { %406 = vperm.xlu1 %670, %v327_v56  }
  0x79   :  { %671 = vset.pattern.permute.xlu0 %v755_v16 }
  0x94   :  { %v116_v57 = vpop.trf.xlu0 }
  0x95   :  { %593 = vmatprep.mubr.f32.mxu0 %v116_v57 }
  0x98   :  { %v117_v58 = vpop.trf.xlu0 }
  0x99   :  { %594 = vmatmul.mubr.f32.vlgmr.msra.gmra.mrb[0].mxu0 %v117_v58  ;;  %v332_v9 = vpop.permute.xlu1 %331 }
  0x9a   :  { %v415_v18 = vmul.f32 %v898_v15, %v332_v9 }
  0x9c   :  { %v118_v59 = vpop.trf.xlu0  ;;  %v431_v20 = vmax.f32 %v415_v18, 1e-08 }
  0x9d   :  { %596 = vmatprep.mubr.f32.mxu0 %v118_v59  ;;  %v337_v10 = vpop.permute.xlu1 %336 }
  0x9e   :  { %v416_v17 = vmul.f32 %v898_v15, %v337_v10 }
  0xa0   :  { %v119_v60 = vpop.trf.xlu0  ;;  %v432_v19 = vmax.f32 %v416_v17, 1e-08 }
  0xa1   :  { %597 = vmatmul.mubr.f32.gmra.mrb[2].mxu0 %v119_v60  ;;  %v342_v11 = vpop.permute.xlu1 %341 }
  0xa2   :  { %672 = vrcp.f32 %v432_v19  ;;  %v417_v23 = vmul.f32 %v898_v15, %v342_v11 }
  0xa3   :  { %674 = vrcp.f32 %v431_v20 }
  0xa4   :  { %v120_v61 = vpop.trf.xlu0  ;;  %v433_v26 = vmax.f32 %v417_v23, 1e-08 }
  0xa5   :  { %599 = vmatprep.mubr.f32.mxu0 %v120_v61  ;;  %v347_v12 = vpop.permute.xlu1 %346 }
  0xa6   :  { %v418_v22 = vmul.f32 %v898_v15, %v347_v12 }
  0xa8   :  { %v121_v62 = vpop.trf.xlu0  ;;  %v434_v25 = vmax.f32 %v418_v22, 1e-08 }
  0xa9   :  { %600 = vmatmul.mubr.f32.gmra.mrb[4].mxu0 %v121_v62  ;;  %v352_v13 = vpop.permute.xlu1 %351 }
  0xaa   :  { %676 = vrcp.f32 %v434_v25  ;;  %v419_v28 = vmul.f32 %v898_v15, %v352_v13 }
  0xab   :  { %678 = vrcp.f32 %v433_v26 }
  0xac   :  { %v122_v63 = vpop.trf.xlu0  ;;  %v673_v30 = vpop.eup %672  ;;  %v435_v37 = vmax.f32 %v419_v28, 1e-08 }
  0xad   :  { %602 = vmatprep.mubr.f32.mxu0 %v122_v63  ;;  %v357_v14 = vpop.permute.xlu1 %356  ;;  %v675_v32 = vpop.eup %674 }
  0xae   :  { %v420_v27 = vmul.f32 %v898_v15, %v357_v14 }
  0xb0   :  { %v123_v0 = vpop.trf.xlu0  ;;  %v436_v35 = vmax.f32 %v420_v27, 1e-08 }
  0xb1   :  { %603 = vmatmul.mubr.f32.gmra.mrb[6].mxu0 %v123_v0  ;;  %v362_v16 = vpop.permute.xlu1 %361 }
  0xb2   :  { %680 = vrcp.f32 %v436_v35  ;;  %v421_v40 = vmul.f32 %v898_v15, %v362_v16 }
  0xb3   :  { %682 = vrcp.f32 %v435_v37 }
  0xb4   :  { %v124_v1 = vpop.trf.xlu0  ;;  %v677_v41 = vpop.eup %676  ;;  %v437_v48 = vmax.f32 %v421_v40, 1e-08 }
  0xb5   :  { %605 = vmatprep.mubr.f32.mxu1 %v124_v1  ;;  %v367_v21 = vpop.permute.xlu1 %366  ;;  %v679_v43 = vpop.eup %678 }
  0xb6   :  { %v422_v39 = vmul.f32 %v898_v15, %v367_v21 }
  0xb8   :  { %v125_v2 = vpop.trf.xlu0  ;;  %v438_v46 = vmax.f32 %v422_v39, 1e-08 }
  0xb9   :  { %606 = vmatmul.mubr.f32.vlgmr.msra.gmra.mrb[0].mxu1 %v125_v2  ;;  %v372_v24 = vpop.permute.xlu1 %371 }
  0xba   :  { %684 = vrcp.f32 %v438_v46  ;;  %v423_v51 = vmul.f32 %v898_v15, %v372_v24 }
  0xbb   :  { %686 = vrcp.f32 %v437_v48 }
  0xbc   :  { %v126_v3 = vpop.trf.xlu0  ;;  %v681_v52 = vpop.eup %680  ;;  %v439_v60 = vmax.f32 %v423_v51, 1e-08 }
  0xbd   :  { %608 = vmatprep.mubr.f32.mxu1 %v126_v3  ;;  %v377_v29 = vpop.permute.xlu1 %376  ;;  %v683_v54 = vpop.eup %682 }
  0xbe   :  { %v424_v50 = vmul.f32 %v898_v15, %v377_v29 }
  0xc0   :  { %v127_v4 = vpop.trf.xlu0  ;;  %v440_v58 = vmax.f32 %v424_v50, 1e-08 }
  0xc1   :  { %609 = vmatmul.mubr.f32.gmra.mrb[2].mxu1 %v127_v4  ;;  %v382_v38 = vpop.permute.xlu1 %381 }
  0xc2   :  { %688 = vrcp.f32 %v440_v58  ;;  %v425_v62 = vmul.f32 %v898_v15, %v382_v38 }
  0xc3   :  { %690 = vrcp.f32 %v439_v60 }
  0xc4   :  { %v128_v5 = vpop.trf.xlu0  ;;  %v685_v0 = vpop.eup %684 }
  0xc5   :  { %611 = vmatprep.mubr.f32.mxu1 %v128_v5  ;;  %v387_v49 = vpop.permute.xlu1 %386  ;;  %v687_v2 = vpop.eup %686 }
  0xc6   :  { %v426_v61 = vmul.f32 %v898_v15, %v387_v49 }
  0xc8   :  { %v129_v6 = vpop.trf.xlu0  ;;  %v442_v5 = vmax.f32 %v426_v61, 1e-08 }
  0xc9   :  { %612 = vmatmul.mubr.f32.gmra.mrb[4].mxu1 %v129_v6  ;;  %v392_v55 = vpop.permute.xlu1 %391 }
  0xca   :  { %692 = vrcp.f32 %v442_v5  ;;  %v427_v10 = vmul.f32 %v898_v15, %v392_v55 }
  0xcc   :  { %v130_v7 = vpop.trf.xlu0  ;;  %v689_v11 = vpop.eup %688  ;;  %v443_v19 = vmax.f32 %v427_v10, 1e-08 }
  0xcd   :  { %614 = vmatprep.mubr.f32.mxu1 %v130_v7  ;;  %v397_v63 = vpop.permute.xlu1 %396  ;;  %v441_v7 = vmax.f32 %v425_v62, 1e-08  ;;  %v691_v13 = vpop.eup %690 }
  0xce   :  { %v428_v9 = vmul.f32 %v898_v15, %v397_v63 }
  0xcf   :  { %694 = vrcp.f32 %v441_v7 }
  0xd0   :  { %v131_v8 = vpop.trf.xlu0  ;;  %v444_v17 = vmax.f32 %v428_v9, 1e-08 }
  0xd1   :  { %615 = vmatmul.mubr.f32.gmra.mrb[6].mxu1 %v131_v8  ;;  %v402_v8 = vpop.permute.xlu1 %401 }
  0xd2   :  { %696 = vrcp.f32 %v444_v17  ;;  %v429_v22 = vmul.f32 %v898_v15, %v402_v8 }
  0xd3   :  { %698 = vrcp.f32 %v443_v19 }
  0xd4   :  { %v693_v23 = vpop.eup %692 }
  0xd5   :  { %v407_v20 = vpop.permute.xlu1 %406 }
  0xd6   :  { %v430_v21 = vmul.f32 %v898_v15, %v407_v20 }
  0xd8   :  { %v446_v28 = vmax.f32 %v430_v21, 1e-08 }
  0xd9   :  { %v695_v25 = vpop.eup %694 }
  0xda   :  { %700 = vrcp.f32 %v446_v28 }
 0x16c   :  { %v595_v31 = vpop.f32.mrb[0].mxu0 }
 0x16d   :  { %v466_v33 = vmul.f32 %v673_v30, %v595_v31  ;;  %v198_v34 = vpop.f32.mrb[1].mxu0  ;;  %v445_v30 = vmax.f32 %v429_v22, 1e-08  ;;  %v697_v31 = vpop.eup %696 }
 0x16e   :  { %v464_v36 = vmul.f32 %v675_v32, %v198_v34 }
 0x16f   :  { %496 = vst [vmem:[#allocation6 + $0x8] sm:$0xff] %v466_v33  ;;  %702 = vrcp.f32 %v445_v30  ;;  %v699_v33 = vpop.eup %698 }
 0x170   :  { %495 = vst [vmem:[#allocation6] sm:$0xff] %v464_v36  ;;  %v701_v15 = vpop.eup %700 }
 0x174   :  { %v598_v42 = vpop.f32.mrb[2].mxu0 }
 0x175   :  { %v470_v44 = vmul.f32 %v677_v41, %v598_v42  ;;  %v208_v45 = vpop.f32.mrb[3].mxu0 }
 0x176   :  { %v468_v47 = vmul.f32 %v679_v43, %v208_v45 }
 0x177   :  { %498 = vst [vmem:[#allocation6 + $0x18] sm:$0xff] %v470_v44 }
 0x178   :  { %497 = vst [vmem:[#allocation6 + $0x10] sm:$0xff] %v468_v47 }
 0x179   :  { %v703_v38 = vpop.eup %702 }
 0x17c   :  { %v601_v53 = vpop.f32.mrb[4].mxu0 }
 0x17d   :  { %v474_v56 = vmul.f32 %v681_v52, %v601_v53  ;;  %v218_v57 = vpop.f32.mrb[5].mxu0 }
 0x17e   :  { %v472_v59 = vmul.f32 %v683_v54, %v218_v57 }
 0x17f   :  { %500 = vst [vmem:[#allocation6 + $0x28] sm:$0xff] %v474_v56 }
 0x180   :  { %499 = vst [vmem:[#allocation6 + $0x20] sm:$0xff] %v472_v59 }
 0x184   :  { %v604_v1 = vpop.f32.mrb[6].mxu0 }
 0x185   :  { %v478_v3 = vmul.f32 %v685_v0, %v604_v1  ;;  %v228_v4 = vpop.f32.mrb[7].mxu0 }
 0x186   :  { %v476_v6 = vmul.f32 %v687_v2, %v228_v4 }
 0x187   :  { %502 = vst [vmem:[#allocation6 + $0x38] sm:$0xff] %v478_v3 }
 0x188   :  { %501 = vst [vmem:[#allocation6 + $0x30] sm:$0xff] %v476_v6 }
 0x18c   :  { %v607_v12 = vpop.f32.mrb[0].mxu1 }
 0x18d   :  { %v482_v14 = vmul.f32 %v689_v11, %v607_v12  ;;  %v238_v16 = vpop.f32.mrb[1].mxu1 }
 0x18e   :  { %v480_v18 = vmul.f32 %v691_v13, %v238_v16 }
 0x18f   :  { %504 = vst [vmem:[#allocation6 + $0x48] sm:$0xff] %v482_v14 }
 0x190   :  { %503 = vst [vmem:[#allocation6 + $0x40] sm:$0xff] %v480_v18 }
 0x194   :  { %v610_v24 = vpop.f32.mrb[2].mxu1 }
 0x195   :  { %v486_v26 = vmul.f32 %v693_v23, %v610_v24  ;;  %v248_v27 = vpop.f32.mrb[3].mxu1 }
 0x196   :  { %v484_v29 = vmul.f32 %v695_v25, %v248_v27 }
 0x197   :  { %506 = vst [vmem:[#allocation6 + $0x58] sm:$0xff] %v486_v26 }
 0x198   :  { %505 = vst [vmem:[#allocation6 + $0x50] sm:$0xff] %v484_v29 }
 0x19c   :  { %v613_v32 = vpop.f32.mrb[4].mxu1 }
 0x19d   :  { %v490_v34 = vmul.f32 %v697_v31, %v613_v32  ;;  %v258_v35 = vpop.f32.mrb[5].mxu1 }
 0x19e   :  { %v488_v36 = vmul.f32 %v699_v33, %v258_v35 }
 0x19f   :  { %508 = vst [vmem:[#allocation6 + $0x68] sm:$0xff] %v490_v34 }
 0x1a0   :  { %507 = vst [vmem:[#allocation6 + $0x60] sm:$0xff] %v488_v36 }
 0x1a4   :  { %v616_v37 = vpop.f32.mrb[6].mxu1 }
 0x1a5   :  { %v494_v39 = vmul.f32 %v701_v15, %v616_v37  ;;  %v268_v40 = vpop.f32.mrb[7].mxu1 }
 0x1a6   :  { %v492_v41 = vmul.f32 %v703_v38, %v268_v40 }
 0x1a7   :  { %510 = vst [vmem:[#allocation6 + $0x78] sm:$0xff] %v494_v39 }
 0x1a8   :  { %509 = vst [vmem:[#allocation6 + $0x70] sm:$0xff] %v492_v41 }
 0x1a9   :  { %737 = shalt.err (!%p734_p12)
}
 0x1aa   :  { %s738_s20 = scalar_lea.hbm %s935_s4, 2048 }
 0x1ab   :  { %p739_p13 = scmp.ne.s32.totalorder %s935_s4, %s738_s20  ;;  %p742_p0 = scmp.lt.u32.totalorder %s738_s20, %s935_s4 }
 0x1ad   :  { %p744_p1 = pnand %p742_p0, %p739_p13 }
 0x1af   :  { %747 = shalt.err (!%p744_p1)
}
 0x1b0   :  { %522 = dma.vmem_to_hbm [thread:$0]  %s517_s16, 2048, %s935_s4, [#allocation5], %s753_s25, %s753_s25, %s754_s26  }
 0x1b1   :  { %750 = dma.done.wait [#allocation5], 2048  }
 0x1b2   :  { %751 = vsyncadd [#allocation5], 4294965248 }
 0x1b3   :  { %526 = vsyncpa [#allocation4], 1 }
 0x1b4   :  { %527 = vsyncpa [#allocation5], 1 }

</bundles_post_ra>
